<compile_context>
chip_gen: v7x
topology: tpu7x:2x2x1
jax: 0.10.0
libtpu: 0.0.40
codegen_flags: <defaults>
</compile_context>

<pallas_src>
import jax
import jax.numpy as jnp
from jax.experimental import pallas as pl
from jax.experimental.pallas import tpu as pltpu


def _round_up(a, b):
    return ((a + b - 1) // b) * b


def att_head_kernel(x_ref, w1_ref, b1_ref, w2_ref, b2_ref, o_ref):
    # x:(tm, IN)  w1:(IN, HID)  b1:(1, HID)  w2:(HID, OUT)  b2:(1,1) in SMEM  o:(tm, OUT)
    h = jnp.dot(x_ref[...], w1_ref[...], preferred_element_type=jnp.float32)  # MXU
    h = jnp.maximum(h + b1_ref[...], 0.0)                                     # bias + ReLU (VPU)
    y = jnp.dot(h, w2_ref[...], preferred_element_type=jnp.float32) + b2_ref[0, 0]
    o_ref[...] = jax.nn.sigmoid(y).astype(o_ref.dtype)


# ~4 MiB of x per grid step: >=85% of HBM roofline per the measured tile sweep.
_X_TILE_BYTES = 4 * 1024 * 1024


@jax.jit
def att_head(x, w1, b1, w2, b2):
    """x: (N, F) -> (N, 1), matching PyTorch Att_Head.forward.

    Params are pre-transposed nn.Linear weights: w1:(F,H) b1:(1,H) w2:(H,1) b2:(1,1).
    """
    N, F = x.shape
    itemsize = jnp.dtype(x.dtype).itemsize

    # Lane-dense fold factor: pack G = 128 // F original rows per folded row.
    # Fall back to G=1 (lane-sparse but copy-free) when F doesn't divide 128 or
    # N isn't a multiple of G -- this is what avoids a full-HBM jnp.pad of x.
    G = 128 // F if (F < 128 and 128 % F == 0) else 1
    if N % G != 0:
        G = 1

    if G > 1:
        x_in = x.reshape(N // G, G * F)                    # free contiguous reshape
        w1_in = jnp.kron(jnp.eye(G, dtype=w1.dtype), w1)   # (G*F, G*H) block-diag
        b1_in = jnp.tile(b1, (1, G))                       # (1, G*H)
        w2_in = jnp.kron(jnp.eye(G, dtype=w2.dtype), w2)   # (G*H, G) block-diag
    else:
        x_in, w1_in, b1_in, w2_in = x, w1, b1, w2

    M, IN = x_in.shape
    HID = w1_in.shape[1]
    OUT = w2_in.shape[1]

    # Row-tile selection: as many rows as ~4 MiB of (lane-padded) x allows, but
    # always >=2 grid blocks when possible so v7x's second TensorCore gets work.
    lane_in = _round_up(IN, 128)
    rows_cap = max(8, (_X_TILE_BYTES // (lane_in * itemsize)) // 8 * 8)
    if M <= 8:
        tm = M                                            # single block == full extent
    else:
        tm = max(8, min(rows_cap, _round_up(pl.cdiv(M, 2), 8)))
    grid = (pl.cdiv(M, tm),)                              # ragged last block OK (no pad)

    # Re-derived VMEM need: double-buffered x + (lane-padded) out tiles + weights.
    def tile_bytes(r, c):
        return _round_up(r, 8) * _round_up(c, 128) * itemsize

    vmem_need = (2 * (tile_bytes(tm, IN) + tile_bytes(tm, OUT))
                 + 2 * (tile_bytes(IN, HID) + tile_bytes(1, HID) + tile_bytes(HID, OUT))
                 + (2 << 20))
    vmem_limit = int(max(32 * 1024 * 1024, vmem_need))    # >= every gen's default, <= physical

    out = pl.pallas_call(
        att_head_kernel,
        out_shape=jax.ShapeDtypeStruct((M, OUT), x.dtype),
        grid=grid,
        in_specs=[
            pl.BlockSpec((tm, IN), lambda i: (i, 0)),            # x: pipelined row tiles
            pl.BlockSpec((IN, HID), lambda i: (0, 0)),           # w1: VMEM resident
            pl.BlockSpec((1, HID), lambda i: (0, 0)),            # b1: VMEM resident
            pl.BlockSpec((HID, OUT), lambda i: (0, 0)),          # w2: VMEM resident
            pl.BlockSpec(memory_space=pltpu.MemorySpace.SMEM),   # b2: scalar in SMEM
        ],
        out_specs=pl.BlockSpec((tm, OUT), lambda i: (i, 0)),
        compiler_params=pltpu.CompilerParams(
            dimension_semantics=("parallel",),                   # megacore sharding on v7x
            vmem_limit_bytes=vmem_limit,
        ),
    )(x_in, w1_in, b1_in, w2_in, b2)

    # (M, G) -> (N, 1): free contiguous reshape; original row G*i+g == out[i, g].
    return out.reshape(N, 1)


def init_params(key, feature_dim, att_im_dim, dtype=jnp.float32):
    # Deterministic synthetic params (PyTorch Linear shapes fc1 (H,F), fc2 (1,H)),
    # stored transposed as (in, out) for the kernel.
    k1, k2, k3, k4 = jax.random.split(key, 4)
    bound1 = 1.0 / jnp.sqrt(feature_dim)
    bound2 = 1.0 / jnp.sqrt(att_im_dim)
    w1 = jax.random.uniform(k1, (feature_dim, att_im_dim), dtype, -bound1, bound1)
    b1 = jax.random.uniform(k2, (1, att_im_dim), dtype, -bound1, bound1)
    w2 = jax.random.uniform(k3, (att_im_dim, 1), dtype, -bound2, bound2)
    b2 = jax.random.uniform(k4, (1, 1), dtype, -bound2, bound2)
    return w1, b1, w2, b2


if __name__ == "__main__":
    FEATURE_DIM = 32
    ATT_IM_DIM = 16

    key = jax.random.PRNGKey(0)
    kx, kp = jax.random.split(key)
    w1, b1, w2, b2 = init_params(kp, FEATURE_DIM, ATT_IM_DIM)

    def ref_fn(x):
        # Plain-JAX reference (same math as the PyTorch module).
        return jax.nn.sigmoid(jnp.maximum(x @ w1 + b1, 0.0) @ w2 + b2)

    # N=8   : tiny single folded block.
    # N=1000: folded fast path, 2 grid blocks with a ragged last block (no pad copy).
    # N=1001: lane-sparse fallback (N not a multiple of the fold), ragged last block.
    for n in (8, 1000, 1001):
        x = jax.random.normal(jax.random.fold_in(kx, n), (n, FEATURE_DIM), jnp.float32)
        out = att_head(x, w1, b1, w2, b2)
        jax.block_until_ready(out)
        ref = ref_fn(x)
        assert out.shape == (n, 1), f"bad shape {out.shape} at N={n}"
        assert jnp.allclose(out, ref, atol=1e-5, rtol=1e-5), f"mismatch at N={n}"

    print("KERNEL_OK")
</pallas_src>

<mosaic_0001>
module attributes {stable_mosaic.version = 11 : i64} {
  func.func @att_head_kernel(%arg0: i32, %arg1: memref<2x128xf32, #tpu.memory_space<vmem>>, %arg2: memref<128x64xf32, #tpu.memory_space<vmem>>, %arg3: memref<1x64xf32, #tpu.memory_space<vmem>>, %arg4: memref<64x4xf32, #tpu.memory_space<vmem>>, %arg5: memref<1x1xf32, #tpu.memory_space<smem>>, %arg6: memref<2x4xf32, #tpu.memory_space<vmem>>) attributes {dimension_semantics = [#tpu.dimension_semantics<parallel>], iteration_bounds = array<i64: 1>, scalar_prefetch = 0 : i64, scratch_operands = 0 : i64, tpu.core_type = #tpu.core_type<tc>, window_params = [{transform_indices = @transform_0, window_bounds = array<i64: 2, 128>}, {pipeline_mode = #tpu.pipeline_mode<synchronous>, transform_indices = @transform_1, window_bounds = array<i64: 128, 64>}, {pipeline_mode = #tpu.pipeline_mode<synchronous>, transform_indices = @transform_2, window_bounds = array<i64: 1, 64>}, {pipeline_mode = #tpu.pipeline_mode<synchronous>, transform_indices = @transform_3, window_bounds = array<i64: 64, 4>}, {transform_indices = @transform_4, window_bounds = array<i64: 1, 1>}, {transform_indices = @transform_5, window_bounds = array<i64: 2, 4>}]} {
    %c0 = arith.constant 0 : index
    %c0_0 = arith.constant 0 : index
    %0 = vector.load %arg1[%c0, %c0_0] : memref<2x128xf32, #tpu.memory_space<vmem>>, vector<2x128xf32>
    %c0_1 = arith.constant 0 : index
    %c0_2 = arith.constant 0 : index
    %1 = vector.load %arg2[%c0_1, %c0_2] : memref<128x64xf32, #tpu.memory_space<vmem>>, vector<128x64xf32>
    %cst = arith.constant dense<0.000000e+00> : vector<2x64xf32>
    %2 = tpu.matmul %0, %1, %cst {dimension_numbers = #tpu.dot_dimension_numbers<[1], [0], [0], [1], [0, 0, 1, 1], [], []>} : vector<2x128xf32>, vector<128x64xf32>, vector<2x64xf32> -> vector<2x64xf32>
    %c0_3 = arith.constant 0 : index
    %c0_4 = arith.constant 0 : index
    %3 = vector.load %arg3[%c0_3, %c0_4] : memref<1x64xf32, #tpu.memory_space<vmem>>, vector<1x64xf32>
    %4 = vector.broadcast %3 : vector<1x64xf32> to vector<2x64xf32>
    %5 = arith.addf %2, %4 : vector<2x64xf32>
    %cst_5 = arith.constant 0.000000e+00 : f32
    %6 = vector.broadcast %cst_5 : f32 to vector<2x64xf32>
    %7 = arith.maximumf %5, %6 : vector<2x64xf32>
    %c0_6 = arith.constant 0 : index
    %c0_7 = arith.constant 0 : index
    %8 = vector.load %arg4[%c0_6, %c0_7] : memref<64x4xf32, #tpu.memory_space<vmem>>, vector<64x4xf32>
    %cst_8 = arith.constant dense<0.000000e+00> : vector<2x4xf32>
    %9 = tpu.matmul %7, %8, %cst_8 {dimension_numbers = #tpu.dot_dimension_numbers<[1], [0], [0], [1], [0, 0, 1, 1], [], []>} : vector<2x64xf32>, vector<64x4xf32>, vector<2x4xf32> -> vector<2x4xf32>
    %c0_9 = arith.constant 0 : index
    %c0_10 = arith.constant 0 : index
    %10 = memref.load %arg5[%c0_9, %c0_10] : memref<1x1xf32, #tpu.memory_space<smem>>
    %11 = vector.broadcast %10 : f32 to vector<2x4xf32>
    %12 = arith.addf %9, %11 : vector<2x4xf32>
    %13 = arith.negf %12 : vector<2x4xf32>
    %14 = math.exp %13 : vector<2x4xf32>
    %cst_11 = arith.constant 1.000000e+00 : f32
    %15 = vector.broadcast %cst_11 : f32 to vector<2x4xf32>
    %16 = arith.addf %15, %14 : vector<2x4xf32>
    %17 = arith.divf %15, %16 : vector<2x4xf32>
    %c0_12 = arith.constant 0 : index
    %c0_13 = arith.constant 0 : index
    %18 = vector.load %arg6[%c0_12, %c0_13] : memref<2x4xf32, #tpu.memory_space<vmem>>, vector<2x4xf32>
    tpu.vector_store %arg6[%c0_12, %c0_13], %17 {strides = array<i32>} : memref<2x4xf32, #tpu.memory_space<vmem>>, vector<2x4xf32>,
    return
  }
  func.func @transform_0(%arg0: i32) -> (i32, i32) {
    %c0_i32 = arith.constant 0 : i32
    %c0_i32_0 = arith.constant 0 : i32
    return %arg0, %c0_i32 : i32, i32
  }
  func.func @transform_1(%arg0: i32) -> (i32, i32) {
    %c0_i32 = arith.constant 0 : i32
    %c0_i32_0 = arith.constant 0 : i32
    %c0_i32_1 = arith.constant 0 : i32
    return %c0_i32, %c0_i32_0 : i32, i32
  }
  func.func @transform_2(%arg0: i32) -> (i32, i32) {
    %c0_i32 = arith.constant 0 : i32
    %c0_i32_0 = arith.constant 0 : i32
    %c0_i32_1 = arith.constant 0 : i32
    return %c0_i32, %c0_i32_0 : i32, i32
  }
  func.func @transform_3(%arg0: i32) -> (i32, i32) {
    %c0_i32 = arith.constant 0 : i32
    %c0_i32_0 = arith.constant 0 : i32
    %c0_i32_1 = arith.constant 0 : i32
    return %c0_i32, %c0_i32_0 : i32, i32
  }
  func.func @transform_4(%arg0: i32) -> (i32, i32) {
    %c0_i32 = arith.constant 0 : i32
    %c0_i32_0 = arith.constant 0 : i32
    %c0_i32_1 = arith.constant 0 : i32
    return %c0_i32, %c0_i32_0 : i32, i32
  }
  func.func @transform_5(%arg0: i32) -> (i32, i32) {
    %c0_i32 = arith.constant 0 : i32
    %c0_i32_0 = arith.constant 0 : i32
    return %arg0, %c0_i32 : i32, i32
  }
}

</mosaic_0001>

<bundles_post_ra>
// kernel: att_head.1
= control target key start
LH: loop header
LB: loop body
LE: loop exit
PB: predicated region body
PF: predicated region fallthrough
CT: control target
= control target key end

     0   :  { %v338_v0 = vmov 0.0|0.0   ;;  %vm339_vm0 = vmmov 0   ;;  %v340_v4 = vmov 0.0   ;;  %vm126_vm1 = vcmask 523264   ;;  %s455_s1 = inlined_call_operand.vmem [shape: f32[128,64], index: 1, kind: input, shape index: {}]   ;;  %s456_s3 = inlined_call_operand.vmem [shape: f32[64,4], index: 3, kind: input, shape index: {}]   ;;  %s457_s0 = inlined_call_operand.vmem [shape: f32[2,128], index: 0, kind: input, shape index: {}]   ;;  %s458_s2 = inlined_call_operand.vmem [shape: f32[1,64], index: 2, kind: input, shape index: {}]   ;;  %s459_s4 = inlined_call_operand.<no memory space> [shape: f32[1,1], index: 4, kind: input, shape index: {}]   ;;  %s460_s5 = inlined_call_operand.vmem [shape: f32[2,4], index: 5, kind: output, shape index: {}]  }
   0x1   :  { %295 = vmatprep.subr.bf16.mxu0 %v338_v0  ;;  %v22_v1 = vld [vmem:[%s455_s1] sm:$0xff]  ;;  %v23_v2 = vld [vmem:[%s455_s1 + $0x8] sm:$0xff]  ;;  %v24_v3 = vld [vmem:[%s455_s1 + $0x10] sm:$0xff]  ;;  %273 = vmatprep.mubr.msk.f32.mxu0 %vm339_vm0, %v340_v4  ;;  %v125_v44 = vstv %s459_s4  ;;  %vm206_vm2 = vcmask 25600  }
   0x2   :  { %v296_v5 = vpack.c.bf16 %v23_v2, %v22_v1  ;;  %v25_v6 = vld [vmem:[%s455_s1 + $0x18] sm:$0xff]  ;;  %319 = vmatprep.subr.bf16.mxu1 %v338_v0  ;;  %292 = vmatprep.mubr.msk.f32.mxu1 %vm339_vm0, %v340_v4  ;;  %v26_v8 = vld [vmem:[%s455_s1 + $0x20] sm:$0xff]  ;;  %v27_v9 = vld [vmem:[%s455_s1 + $0x28] sm:$0xff] }
   0x3   :  { %v299_v7 = vpack.c.bf16 %v25_v6, %v24_v3  ;;  %v116_v10 = vld [vmem:[%s456_s3] sm:$0xff]  ;;  %v117_v11 = vld [vmem:[%s456_s3 + $0x8] sm:$0xff]  ;;  %v118_v12 = vld [vmem:[%s456_s3 + $0x10] sm:$0xff]  ;;  %v302_v14 = vpack.c.bf16 %v27_v9, %v26_v8 }
   0x4   :  { %297 = vmatpush3.bf16.msra.mxu0 %v296_v5  ;;  %v119_v13 = vld [vmem:[%s456_s3 + $0x18] sm:$0xff]  ;;  %v320_v15 = vpack.c.bf16 %v117_v11, %v116_v10  ;;  %v28_v16 = vld [vmem:[%s455_s1 + $0x30] sm:$0xff]  ;;  %v120_v19 = vld [vmem:[%s456_s3 + $0x20] sm:$0xff] }
   0x5   :  { %298 = vmatprep.subr.bf16.mxu0 %v338_v0  ;;  %v29_v17 = vld [vmem:[%s455_s1 + $0x38] sm:$0xff]  ;;  %v323_v18 = vpack.c.bf16 %v119_v13, %v118_v12  ;;  %v121_v20 = vld [vmem:[%s456_s3 + $0x28] sm:$0xff]  ;;  %v30_v22 = vld [vmem:[%s455_s1 + $0x40] sm:$0xff] }
   0x6   :  { %321 = vmatpush3.bf16.msra.mxu1 %v320_v15  ;;  %v305_v21 = vpack.c.bf16 %v29_v17, %v28_v16  ;;  %v31_v23 = vld [vmem:[%s455_s1 + $0x48] sm:$0xff]  ;;  %v326_v24 = vpack.c.bf16 %v121_v20, %v120_v19  ;;  %v32_v26 = vld [vmem:[%s455_s1 + $0x50] sm:$0xff]  ;;  %v33_v27 = vld [vmem:[%s455_s1 + $0x58] sm:$0xff] }
   0x7   :  { %322 = vmatprep.subr.bf16.mxu1 %v338_v0  ;;  %v308_v25 = vpack.c.bf16 %v31_v23, %v30_v22  ;;  %v311_v28 = vpack.c.bf16 %v33_v27, %v32_v26  ;;  %v34_v29 = vld [vmem:[%s455_s1 + $0x60] sm:$0xff]  ;;  %v35_v30 = vld [vmem:[%s455_s1 + $0x68] sm:$0xff]  ;;  %v36_v32 = vld [vmem:[%s455_s1 + $0x70] sm:$0xff] }
   0x8   :  { %300 = vmatpush3.bf16.msra.mxu0 %v299_v7  ;;  %v314_v31 = vpack.c.bf16 %v35_v30, %v34_v29  ;;  %v37_v33 = vld [vmem:[%s455_s1 + $0x78] sm:$0xff]  ;;  %v21_v35 = vld [vmem:[%s457_s0] sm:$0x3]  ;;  %v122_v36 = vld [vmem:[%s456_s3 + $0x30] sm:$0xff] }
   0x9   :  { %301 = vmatprep.subr.bf16.mxu0 %v338_v0  ;;  %v317_v34 = vpack.c.bf16 %v37_v33, %v36_v32  ;;  %v123_v37 = vld [vmem:[%s456_s3 + $0x38] sm:$0xff]  ;;  %v212_v39 = vld [vmem:[%s458_s2] ss:$0 sm:$0xff] }
   0xa   :  { %324 = vmatpush3.bf16.msra.mxu1 %v323_v18  ;;  %v329_v38 = vpack.c.bf16 %v123_v37, %v122_v36 }
   0xb   :  { %325 = vmatprep.subr.bf16.mxu1 %v338_v0 }
   0xc   :  { %303 = vmatpush3.bf16.msra.mxu0 %v302_v14 }
   0xd   :  { %304 = vmatprep.subr.bf16.mxu0 %v338_v0 }
   0xe   :  { %327 = vmatpush3.bf16.msra.mxu1 %v326_v24 }
   0xf   :  { %328 = vmatprep.subr.bf16.mxu1 %v338_v0 }
  0x10   :  { %306 = vmatpush3.bf16.msra.mxu0 %v305_v21 }
  0x11   :  { %307 = vmatprep.subr.bf16.mxu0 %v338_v0 }
  0x12   :  { %330 = vmatpush3.bf16.msra.mxu1 %v329_v38 }
  0x14   :  { %309 = vmatpush3.bf16.msra.mxu0 %v308_v25 }
  0x15   :  { %310 = vmatprep.subr.bf16.mxu0 %v338_v0 }
  0x18   :  { %312 = vmatpush3.bf16.msra.mxu0 %v311_v28 }
  0x19   :  { %313 = vmatprep.subr.bf16.mxu0 %v338_v0 }
  0x1c   :  { %315 = vmatpush3.bf16.msra.mxu0 %v314_v31 }
  0x1d   :  { %316 = vmatprep.subr.bf16.mxu0 %v338_v0 }
  0x20   :  { %318 = vmatpush3.bf16.msra.mxu0 %v317_v34 }
  0x23   :  { %274 = vmatmul.mubr.f32.vlgmr.msra.gmra.mrb[0].mxu0 %v21_v35 }
  0xf6   :  { %v111_v40 = vpop.f32.mrb[0].mxu0 }
  0xf7   :  { %v112_v41 = vadd.f32 %v212_v39, %v111_v40  ;;  %v275_v42 = vpop.f32.mrb[1].mxu0 }
  0xf9   :  { %v115_v43 = vmax.f32 %v112_v41, 0.0 }
  0xfb   :  { %293 = vmatmul.mubr.msk.f32.vlgmr.msra.gmra.mrb[0].mxu1 %vm126_vm1, %v115_v43 }
 0x1ce   :  { %v196_v45 = vpop.f32.mrb[0].mxu1 }
 0x1cf   :  { %v197_v46 = vadd.f32 %v196_v45, %v125_v44  ;;  %v294_v47 = vpop.f32.mrb[1].mxu1 }
 0x1d1   :  { %v214_v48 = vmul.f32 -1.442695, %v197_v46 }
 0x1d3   :  { %334 = vpow2.f32 %v214_v48 }
 0x1dd   :  { %v335_v49 = vpop.eup %334 }
 0x1de   :  { %v203_v50 = vadd.f32 1.0, %v335_v49 }
 0x1e0   :  { %336 = vrcp.f32 %v203_v50 }
 0x1ea   :  { %v337_v51 = vpop.eup %336 }
 0x1eb   :  { %207 = vst.msk [vmem:[%s460_s5] sm:$0x3] %vm206_vm2, %v337_v51 }

</bundles_post_ra>
